<compile_context>
chip_gen: v6e
topology: v6e:2x2x1
jax: 0.10.0
libtpu: 0.0.40
codegen_flags: <defaults>
</compile_context>

<pallas_src>
import functools

import jax
import jax.numpy as jnp
from jax.experimental import pallas as pl
from jax.experimental.pallas import tpu as pltpu

N_CLS = 4


# ---------------------------------------------------------------- kernel ----

def classifier_kernel(x_ref, w_ref, b_ref, out_ref, *, in_dim):
    """out = softmax(att * (x @ W_eff) + b_eff), fused; single MXU dot.

    x_ref: [N, in_dim + 1] slab = cat([h_src, h_tgt, h_arc], 1) with h_att2
           packed as the last column.
    w_ref: [in_dim, n_cls]   (pre-folded, pre-transposed)
    b_ref: [1, n_cls]
    """
    x = x_ref[:, :in_dim]                       # [N, in_dim]
    att = x_ref[:, in_dim:in_dim + 1]           # [N, 1]
    # (att * x) @ W == att * (x @ W): fold the row-scale after the matmul.
    logits = att * jnp.dot(x, w_ref[...],
                           preferred_element_type=jnp.float32) + b_ref[...]
    # Numerically stable softmax over the last (lane) axis.
    m = jnp.max(logits, axis=-1, keepdims=True)
    e = jnp.exp(logits - m)
    out_ref[...] = e * pl.reciprocal(jnp.sum(e, axis=-1, keepdims=True),
                                     approx=False)


# --------------------------------------------------------------- folding ----

def fold_params(params, in_dim, multi_layer):
    """Fold torch-layout weights ([out, in]) into a single [in_dim, 4] matrix
    and [1, 4] bias, valid because the torch Classifier applies NO activation
    between layer1/layer2/layer3."""
    hp = jax.lax.Precision.HIGHEST
    if not multi_layer:
        w = jnp.asarray(params["w"], jnp.float32)
        b = jnp.asarray(params["b"], jnp.float32)
        assert w.shape == (N_CLS, in_dim)
        w_eff = w.T                                             # [in_dim, 4]
        b_eff = b.reshape(1, -1)                                # [1, 4]
    else:
        w1 = jnp.asarray(params["w1"], jnp.float32)
        b1 = jnp.asarray(params["b1"], jnp.float32)
        w2 = jnp.asarray(params["w2"], jnp.float32)
        b2 = jnp.asarray(params["b2"], jnp.float32)
        w3 = jnp.asarray(params["w3"], jnp.float32)
        b3 = jnp.asarray(params["b3"], jnp.float32)
        assert w1.shape[1] == in_dim and w3.shape[0] == N_CLS
        assert w1.shape[0] == w2.shape[1] and w2.shape[0] == w3.shape[1]
        # out = ((x W1^T + b1) W2^T + b2) W3^T + b3
        w_eff = jnp.dot(jnp.dot(w1.T, w2.T, precision=hp), w3.T, precision=hp)
        b_eff = (jnp.dot(jnp.dot(b1.reshape(1, -1), w2.T, precision=hp),
                         w3.T, precision=hp)
                 + jnp.dot(b2.reshape(1, -1), w3.T, precision=hp)
                 + b3.reshape(1, -1))
    return {"w_eff": w_eff.astype(jnp.float32),
            "b_eff": b_eff.astype(jnp.float32)}


# --------------------------------------------------------------- wrapper ----

def classifier_forward(h_att2, h_src, h_tgt, h_arc, kparams):
    n = h_src.shape[0]
    in_dim, n_cls = kparams["w_eff"].shape
    assert in_dim == h_src.shape[1] + h_tgt.shape[1] + h_arc.shape[1]
    assert h_att2.shape == (n, 1)

    # Single activation slab: concat order matches torch cat(src, cat(tgt, arc)),
    # with h_att2 packed as the trailing column (one DMA instead of four).
    x_slab = jnp.concatenate(
        [h_src.astype(jnp.float32), h_tgt.astype(jnp.float32),
         h_arc.astype(jnp.float32), h_att2.astype(jnp.float32)], axis=1)

    vmem = pl.BlockSpec(memory_space=pltpu.MemorySpace.VMEM)
    kernel = functools.partial(classifier_kernel, in_dim=in_dim)
    return pl.pallas_call(
        kernel,
        out_shape=jax.ShapeDtypeStruct((n, n_cls), jnp.float32),
        in_specs=[vmem, vmem, vmem],
        out_specs=vmem,
    )(x_slab, kparams["w_eff"], kparams["b_eff"])


# ---------------------------------------------------------- param init ------

def init_classifier_params(key, in_dim, multi_layer):
    """Deterministic nn.Linear-style params, stored in torch [out, in] layout."""
    def linear(k, out_dim, d_in):
        kw, kb = jax.random.split(k)
        bound = 1.0 / jnp.sqrt(jnp.float32(d_in))
        w = jax.random.uniform(kw, (out_dim, d_in), jnp.float32, -bound, bound)
        b = jax.random.uniform(kb, (out_dim,), jnp.float32, -bound, bound)
        return w, b

    if not multi_layer:
        w, b = linear(key, N_CLS, in_dim)
        return {"w": w, "b": b}
    k1, k2, k3 = jax.random.split(key, 3)
    w1, b1 = linear(k1, 128, in_dim)
    w2, b2 = linear(k2, 128, 128)
    w3, b3 = linear(k3, N_CLS, 128)
    return {"w1": w1, "b1": b1, "w2": w2, "b2": b2, "w3": w3, "b3": b3}


# ------------------------------------------------------- pure-JAX check -----

def classifier_reference(h_att2, h_src, h_tgt, h_arc, params, multi_layer):
    deps = jnp.concatenate([h_tgt, h_arc], axis=1)
    src_arcs = jnp.concatenate([h_src, deps], axis=1)
    infeats = h_att2 * src_arcs
    if multi_layer:
        out = infeats @ params["w1"].T + params["b1"]
        out = out @ params["w2"].T + params["b2"]
        out = out @ params["w3"].T + params["b3"]
    else:
        out = infeats @ params["w"].T + params["b"]
    return jax.nn.softmax(out, axis=-1)   # F.softmax default dim for 2-D is 1


# ------------------------------------------------------------------ main ----

if __name__ == "__main__":
    # Keep host-side folding / reference matmuls at full f32 so the kernel
    # comparison is meaningful.
    jax.config.update("jax_default_matmul_precision", "highest")

    N, D_SRC, D_TGT, D_ARC = 8, 16, 16, 16
    IN_DIM = D_SRC + D_TGT + D_ARC

    key = jax.random.PRNGKey(0)
    k_att, k_src, k_tgt, k_arc, k_p1, k_p2 = jax.random.split(key, 6)
    h_att2 = jax.random.normal(k_att, (N, 1), dtype=jnp.float32)
    h_src = jax.random.normal(k_src, (N, D_SRC), dtype=jnp.float32)
    h_tgt = jax.random.normal(k_tgt, (N, D_TGT), dtype=jnp.float32)
    h_arc = jax.random.normal(k_arc, (N, D_ARC), dtype=jnp.float32)

    for multi_layer, k_par in ((False, k_p1), (True, k_p2)):
        params = init_classifier_params(k_par, IN_DIM, multi_layer)
        kparams = fold_params(params, IN_DIM, multi_layer)
        out = jax.block_until_ready(
            classifier_forward(h_att2, h_src, h_tgt, h_arc, kparams))
        ref = classifier_reference(h_att2, h_src, h_tgt, h_arc, params,
                                   multi_layer)
        assert out.shape == (N, N_CLS)
        assert jnp.allclose(out, ref, rtol=5e-4, atol=5e-5), multi_layer
        assert jnp.allclose(jnp.sum(out, axis=-1), 1.0, atol=1e-5)

    print("KERNEL_OK")
</pallas_src>

<mosaic_0001>
module attributes {stable_mosaic.version = 11 : i64} {
  func.func @classifier_kernel(%arg0: memref<8x49xf32, #tpu.memory_space<vmem>>, %arg1: memref<48x4xf32, #tpu.memory_space<vmem>>, %arg2: memref<1x4xf32, #tpu.memory_space<vmem>>, %arg3: memref<8x4xf32, #tpu.memory_space<vmem>>) attributes {dimension_semantics = [], scalar_prefetch = 0 : i64, scratch_operands = 0 : i64, tpu.core_type = #tpu.core_type<tc>} {
    %c0 = arith.constant 0 : index
    %c0_0 = arith.constant 0 : index
    %0 = vector.load %arg0[%c0, %c0_0] : memref<8x49xf32, #tpu.memory_space<vmem>>, vector<8x48xf32>
    %c0_1 = arith.constant 0 : index
    %c48 = arith.constant 48 : index
    %1 = vector.load %arg0[%c0_1, %c48] : memref<8x49xf32, #tpu.memory_space<vmem>>, vector<8x1xf32>
    %c0_2 = arith.constant 0 : index
    %c0_3 = arith.constant 0 : index
    %2 = vector.load %arg1[%c0_2, %c0_3] : memref<48x4xf32, #tpu.memory_space<vmem>>, vector<48x4xf32>
    %cst = arith.constant dense<0.000000e+00> : vector<8x4xf32>
    %3 = tpu.matmul %0, %2, %cst {dimension_numbers = #tpu.dot_dimension_numbers<[1], [0], [0], [1], [0, 0, 1, 1], [], []>, precision = #tpu.contract_precision<fp32>} : vector<8x48xf32>, vector<48x4xf32>, vector<8x4xf32> -> vector<8x4xf32>
    %4 = vector.broadcast %1 : vector<8x1xf32> to vector<8x4xf32>
    %5 = arith.mulf %4, %3 : vector<8x4xf32>
    %c0_4 = arith.constant 0 : index
    %c0_5 = arith.constant 0 : index
    %6 = vector.load %arg2[%c0_4, %c0_5] : memref<1x4xf32, #tpu.memory_space<vmem>>, vector<1x4xf32>
    %7 = vector.broadcast %6 : vector<1x4xf32> to vector<8x4xf32>
    %8 = arith.addf %5, %7 : vector<8x4xf32>
    %cst_6 = arith.constant dense<0xFF800000> : vector<8xf32>
    %9 = vector.multi_reduction <maximumf>, %8, %cst_6 [1] : vector<8x4xf32> to vector<8xf32>
    %10 = vector.shape_cast %9 : vector<8xf32> to vector<8x1xf32>
    %11 = vector.broadcast %10 : vector<8x1xf32> to vector<8x4xf32>
    %12 = arith.subf %8, %11 : vector<8x4xf32>
    %13 = math.exp %12 : vector<8x4xf32>
    %cst_7 = arith.constant dense<0.000000e+00> : vector<8xf32>
    %14 = vector.multi_reduction <add>, %13, %cst_7 [1] : vector<8x4xf32> to vector<8xf32>
    %15 = vector.shape_cast %14 : vector<8xf32> to vector<8x1xf32>
    %16 = tpu.reciprocal %15 : vector<8x1xf32> -> vector<8x1xf32>
    %17 = vector.broadcast %16 : vector<8x1xf32> to vector<8x4xf32>
    %18 = arith.mulf %13, %17 : vector<8x4xf32>
    %c0_8 = arith.constant 0 : index
    %c0_9 = arith.constant 0 : index
    %19 = vector.load %arg3[%c0_8, %c0_9] : memref<8x4xf32, #tpu.memory_space<vmem>>, vector<8x4xf32>
    tpu.vector_store %arg3[%c0_8, %c0_9], %18 {strides = array<i32>} : memref<8x4xf32, #tpu.memory_space<vmem>>, vector<8x4xf32>,
    return
  }
}

</mosaic_0001>

<bundles_post_ra>
// kernel: tpu_custom_call.1
= control target key start
LH: loop header
LB: loop body
LE: loop exit
PB: predicated region body
PF: predicated region fallthrough
CT: control target
= control target key end

     0   :  { %v707_v0 = vmov 0.0   ;;  %vm21_vm0 = vcmask 392192   ;;  %vm708_vm1 = vmmov 0   ;;  %v709_v14 = vmov 48   ;;  %s914_s1 = inlined_call_operand.vmem [shape: f32[48,4], index: 1, kind: input, shape index: {}]   ;;  %s915_s0 = inlined_call_operand.vmem [shape: f32[8,49], index: 0, kind: input, shape index: {}]   ;;  %s916_s2 = inlined_call_operand.vmem [shape: f32[1,4], index: 2, kind: input, shape index: {}]   ;;  %s917_s3 = inlined_call_operand.vmem [shape: f32[8,4], index: 3, kind: output, shape index: {}]  }
   0x1   :  { %609 = vmatprep.subr.mxu0 %v707_v0  ;;  %v20_v1 = vld [vmem:[%s914_s1 + $0x28] sm:$0xff]  ;;  %v19_v2 = vld [vmem:[%s914_s1 + $0x20] sm:$0xff]  ;;  %v18_v3 = vld [vmem:[%s914_s1 + $0x18] sm:$0xff]  ;;  %624 = vmatprep.subr.mxu1 %v707_v0  ;;  %vm549_vm2 = vcmask 31744  }
   0x2   :  { %v741_v4 = vand.u32 4294901760, %v20_v1  ;;  %v743_v5 = vand.u32 4294901760, %v19_v2  ;;  %v745_v6 = vand.u32 4294901760, %v18_v3  ;;  %v17_v7 = vld [vmem:[%s914_s1 + $0x10] sm:$0xff]  ;;  %v16_v8 = vld [vmem:[%s914_s1 + $0x8] sm:$0xff]  ;;  %v15_v9 = vld [vmem:[%s914_s1] sm:$0xff]  ;;  %621 = vmatprep.mubr.msk.f32.mxu0 %vm708_vm1, %v707_v0  ;;  %636 = vmatprep.mubr.msk.f32.mxu1 %vm708_vm1, %v707_v0 }
   0x3   :  { %v760_v10 = vand.u32 4294901760, %v17_v7  ;;  %v762_v11 = vand.u32 4294901760, %v16_v8  ;;  %v764_v12 = vand.u32 4294901760, %v15_v9  ;;  %v14_v13 = vld [vmem:[%s915_s0] sm:$0xff]  ;;  %702 = vset.pattern.permute.xlu0 %v709_v14 }
   0x4   :  { %610 = vmatpush3.msra.mxu0 %v741_v4  ;;  %v771_v15 = vsub.f32 %v20_v1, %v741_v4  ;;  %v774_v16 = vsub.f32 %v19_v2, %v743_v5  ;;  %v23_v17 = vsel %vm21_vm0, %v14_v13, 0  ;;  %v778_v18 = vsub.f32 %v18_v3, %v745_v6  ;;  %537 = vperm.xlu0 %702, %v14_v13   ;;  %v566_v63 = vld [vmem:[%s916_s2] ss:$0 sm:$0xff] }
   0x5   :  { %611 = vmatprep.subr.mxu0 %v707_v0  ;;  %v781_v19 = vand.u32 4294901760, %v23_v17  ;;  %v784_v20 = vsub.f32 %v17_v7, %v760_v10  ;;  %v787_v21 = vsub.f32 %v16_v8, %v762_v11  ;;  %v794_v25 = vsub.f32 %v15_v9, %v764_v12 }
   0x6   :  { %612 = vmatpush3.msra.mxu0 %v743_v5  ;;  %v129_v22 = vand.u32 4294901760, %v771_v15  ;;  %v136_v23 = vand.u32 4294901760, %v774_v16  ;;  %v143_v24 = vand.u32 4294901760, %v778_v18 }
   0x7   :  { %613 = vmatprep.subr.mxu0 %v707_v0  ;;  %v798_v26 = vsub.f32 %v23_v17, %v781_v19  ;;  %v150_v27 = vand.u32 4294901760, %v784_v20  ;;  %v157_v31 = vand.u32 4294901760, %v787_v21  ;;  %v164_v36 = vand.u32 4294901760, %v794_v25 }
   0x8   :  { %614 = vmatpush3.msra.mxu0 %v745_v6  ;;  %v130_v28 = vsub.f32 %v771_v15, %v129_v22  ;;  %v137_v29 = vsub.f32 %v774_v16, %v136_v23  ;;  %v144_v30 = vsub.f32 %v778_v18, %v143_v24 }
   0x9   :  { %615 = vmatprep.subr.mxu0 %v707_v0  ;;  %v98_v32 = vand.u32 4294901760, %v798_v26  ;;  %v151_v35 = vsub.f32 %v784_v20, %v150_v27  ;;  %v158_v39 = vsub.f32 %v787_v21, %v157_v31  ;;  %v165_v42 = vsub.f32 %v794_v25, %v164_v36 }
   0xa   :  { %616 = vmatpush3.msra.mxu0 %v760_v10  ;;  %v131_v33 = vand.u32 4294901760, %v130_v28  ;;  %v138_v34 = vand.u32 4294901760, %v137_v29  ;;  %v145_v38 = vand.u32 4294901760, %v144_v30 }
   0xb   :  { %617 = vmatprep.subr.mxu0 %v707_v0  ;;  %v99_v37 = vsub.f32 %v798_v26, %v98_v32  ;;  %v152_v41 = vand.u32 4294901760, %v151_v35  ;;  %v159_v43 = vand.u32 4294901760, %v158_v39  ;;  %v166_v44 = vand.u32 4294901760, %v165_v42 }
   0xc   :  { %618 = vmatpush3.msra.mxu0 %v762_v11  ;;  %625 = vmatpush3.msra.mxu1 %v131_v33 }
   0xd   :  { %619 = vmatprep.subr.mxu0 %v707_v0  ;;  %626 = vmatprep.subr.mxu1 %v707_v0  ;;  %v100_v40 = vand.u32 4294901760, %v99_v37 }
   0xe   :  { %620 = vmatpush3.msra.mxu0 %v764_v12  ;;  %627 = vmatpush3.msra.mxu1 %v138_v34 }
   0xf   :  { %628 = vmatprep.subr.mxu1 %v707_v0  ;;  %639 = vmatprep.subr.mxu0 %v707_v0 }
  0x10   :  { %622 = vmatmul.mubr.f32.vlgmr.msra.gmra.mxu0 %v100_v40  ;;  %629 = vmatpush3.msra.mxu1 %v145_v38 }
  0x11   :  { %640 = vmatpush3.msra.mxu0 %v771_v15  ;;  %630 = vmatprep.subr.mxu1 %v707_v0 }
  0x12   :  { %641 = vmatprep.subr.mxu0 %v707_v0  ;;  %631 = vmatpush3.msra.mxu1 %v152_v41 }
  0x13   :  { %642 = vmatpush3.msra.mxu0 %v774_v16  ;;  %632 = vmatprep.subr.mxu1 %v707_v0 }
  0x14   :  { %643 = vmatprep.subr.mxu0 %v707_v0  ;;  %633 = vmatpush3.msra.mxu1 %v159_v43 }
  0x15   :  { %644 = vmatpush3.msra.mxu0 %v778_v18  ;;  %634 = vmatprep.subr.mxu1 %v707_v0 }
  0x16   :  { %645 = vmatprep.subr.mxu0 %v707_v0  ;;  %635 = vmatpush3.msra.mxu1 %v166_v44 }
  0x17   :  { %646 = vmatpush3.msra.mxu0 %v784_v20  ;;  %637 = vmatmul.mubr.f32.vlgmr.msra.gmra.mxu1 %v781_v19 }
  0x18   :  { %647 = vmatprep.subr.mxu0 %v707_v0  ;;  %654 = vmatprep.subr.mxu1 %v707_v0 }
  0x19   :  { %648 = vmatpush3.msra.mxu0 %v787_v21  ;;  %655 = vmatpush3.msra.mxu1 %v741_v4 }
  0x1a   :  { %649 = vmatprep.subr.mxu0 %v707_v0  ;;  %656 = vmatprep.subr.mxu1 %v707_v0 }
  0x1b   :  { %650 = vmatpush3.msra.mxu0 %v794_v25  ;;  %651 = vmatprep.mubr.msk.f32.mxu0 %vm708_vm1, %v707_v0 }
  0x1c   :  { %657 = vmatpush3.msra.mxu1 %v743_v5  ;;  %652 = vmatmul.mubr.f32.vlgmr.msra.gmra.mxu0 %v798_v26 }
  0x1d   :  { %658 = vmatprep.subr.mxu1 %v707_v0  ;;  %669 = vmatprep.subr.mxu0 %v707_v0 }
  0x1e   :  { %659 = vmatpush3.msra.mxu1 %v745_v6  ;;  %670 = vmatpush3.msra.mxu0 %v129_v22 }
  0x1f   :  { %660 = vmatprep.subr.mxu1 %v707_v0  ;;  %671 = vmatprep.subr.mxu0 %v707_v0 }
  0x20   :  { %661 = vmatpush3.msra.mxu1 %v760_v10  ;;  %672 = vmatpush3.msra.mxu0 %v136_v23 }
  0x21   :  { %662 = vmatprep.subr.mxu1 %v707_v0  ;;  %673 = vmatprep.subr.mxu0 %v707_v0 }
  0x22   :  { %663 = vmatpush3.msra.mxu1 %v762_v11  ;;  %674 = vmatpush3.msra.mxu0 %v143_v24 }
  0x23   :  { %664 = vmatprep.subr.mxu1 %v707_v0  ;;  %675 = vmatprep.subr.mxu0 %v707_v0 }
  0x24   :  { %665 = vmatpush3.msra.mxu1 %v764_v12  ;;  %666 = vmatprep.mubr.msk.f32.mxu1 %vm708_vm1, %v707_v0 }
  0x25   :  { %676 = vmatpush3.msra.mxu0 %v150_v27  ;;  %667 = vmatmul.mubr.f32.vlgmr.msra.gmra.mxu1 %v98_v32 }
  0x26   :  { %677 = vmatprep.subr.mxu0 %v707_v0  ;;  %684 = vmatprep.subr.mxu1 %v707_v0 }
  0x27   :  { %678 = vmatpush3.msra.mxu0 %v157_v31  ;;  %685 = vmatpush3.msra.mxu1 %v741_v4 }
  0x28   :  { %679 = vmatprep.subr.mxu0 %v707_v0  ;;  %686 = vmatprep.subr.mxu1 %v707_v0 }
  0x29   :  { %680 = vmatpush3.msra.mxu0 %v164_v36  ;;  %681 = vmatprep.mubr.msk.f32.mxu0 %vm708_vm1, %v707_v0 }
  0x2a   :  { %687 = vmatpush3.msra.mxu1 %v743_v5  ;;  %682 = vmatmul.mubr.f32.vlgmr.msra.gmra.mxu0 %v781_v19 }
  0x2b   :  { %688 = vmatprep.subr.mxu1 %v707_v0  ;;  %696 = vmatprep.mubr.msk.f32.mxu1 %vm708_vm1, %v707_v0 }
  0x2c   :  { %689 = vmatpush3.msra.mxu1 %v745_v6 }
  0x2d   :  { %690 = vmatprep.subr.mxu1 %v707_v0 }
  0x2e   :  { %691 = vmatpush3.msra.mxu1 %v760_v10 }
  0x2f   :  { %692 = vmatprep.subr.mxu1 %v707_v0 }
  0x30   :  { %693 = vmatpush3.msra.mxu1 %v762_v11 }
  0x31   :  { %694 = vmatprep.subr.mxu1 %v707_v0 }
  0x32   :  { %695 = vmatpush3.msra.mxu1 %v764_v12 }
  0x33   :  { %697 = vmatmul.mubr.f32.vlgmr.msra.gmra.mxu1 %v781_v19 }
  0x7f   :  { %v538_v60 = vpop.permute.xlu0 %537 }
  0xd0   :  { %v102_v45 = vpop.f32.mrf.mxu0 }
  0xd2   :  { %v623_v46 = vpop.f32.mrf.mxu0 }
  0xd7   :  { %v203_v47 = vpop.f32.mrf.mxu1 }
  0xd8   :  { %v204_v54 = vadd.f32 %v203_v47, %v102_v45 }
  0xd9   :  { %v638_v48 = vpop.f32.mrf.mxu1 }
  0xdc   :  { %v287_v49 = vpop.f32.mrf.mxu0 }
  0xdd   :  { %v288_v56 = vadd.f32 %v287_v49, %v204_v54 }
  0xde   :  { %v653_v50 = vpop.f32.mrf.mxu0 }
  0xe5   :  { %v366_v51 = vpop.f32.mrf.mxu1 }
  0xe6   :  { %v367_v57 = vadd.f32 %v366_v51, %v288_v56 }
  0xe7   :  { %v668_v52 = vpop.f32.mrf.mxu1 }
  0xea   :  { %v455_v53 = vpop.f32.mrf.mxu0 }
  0xeb   :  { %v456_v58 = vadd.f32 %v455_v53, %v367_v57 }
  0xec   :  { %v683_v55 = vpop.f32.mrf.mxu0 }
  0xf3   :  { %v532_v59 = vpop.f32.mrf.mxu1 }
  0xf4   :  { %v533_v61 = vadd.f32 %v532_v59, %v456_v58 }
  0xf5   :  { %v698_v62 = vpop.f32.mrf.mxu1 }
  0xf6   :  { %v540_v0 = vmul.f32 %v538_v60, %v533_v61 }
  0xf8   :  { %v548_v1 = vadd.f32 %v566_v63, %v540_v0 }
  0xfa   :  { %v550_v2 = vsel %vm549_vm2, %v548_v1, -inf }
  0xfb   :  { %551 = vmax.xlane.f32.xlu0 %v550_v2 }
 0x184   :  { %v552_v3 = vpop.xlane.xlu0 %551 }
 0x185   :  { %v553_v4 = vsub.f32 %v548_v1, %v552_v3 }
 0x187   :  { %v554_v5 = vmul.f32 1.442695, %v553_v4 }
 0x189   :  { %703 = vpow2.f32 %v554_v5 }
 0x196   :  { %v704_v6 = vpop.eup %703 }
 0x197   :  { %v556_v7 = vsel %vm549_vm2, %v704_v6, 0.0 }
 0x198   :  { %557 = vadd.xlane.f32.xlu1 %v556_v7 }
 0x221   :  { %v558_v8 = vpop.xlane.xlu1 %557 }
 0x222   :  { %705 = vrcp.f32 %v558_v8 }
 0x22f   :  { %v706_v9 = vpop.eup %705 }
 0x230   :  { %v560_v10 = vmul.f32 %v706_v9, %v704_v6 }
 0x232   :  { %561 = vst.msk [vmem:[%s917_s3] sm:$0xff] %vm549_vm2, %v560_v10 }

</bundles_post_ra>
